<compile_context>
chip_gen: v5e
topology: v5e:2x2
jax: 0.10.0
libtpu: 0.0.40
codegen_flags: <defaults>
</compile_context>

<pallas_src>
import jax
import jax.numpy as jnp
from jax import lax
from jax.experimental import pallas as pl
from jax.experimental.pallas import tpu as pltpu


def _round_up(x, m):
    return ((x + m - 1) // m) * m


def _pad_axis(x, axis, target):
    pad = target - x.shape[axis]
    if pad <= 0:
        return x
    widths = [(0, 0)] * x.ndim
    widths[axis] = (0, pad)
    return jnp.pad(x, widths)


# --------------------------------------------------------------------------
# General batched path: out[b, m, n] = sum_d a[b, m, d] * b[b, n, d]
# --------------------------------------------------------------------------
def _bmm_nt_kernel(a_ref, b_ref, o_ref, acc_ref):
    # batch dim is squeezed: a_ref (tm, tk), b_ref (tn, tk), o_ref (tm, tn)
    k = pl.program_id(3)

    @pl.when(k == 0)
    def _():
        acc_ref[...] = jnp.zeros_like(acc_ref)

    # Contract over the last dim of both operands (rhs-transposed matmul),
    # accumulating in f32 on the MXU.
    acc_ref[...] += lax.dot_general(
        a_ref[...],
        b_ref[...],
        dimension_numbers=(((1,), (1,)), ((), ())),
        preferred_element_type=jnp.float32,
    )

    @pl.when(k == pl.num_programs(3) - 1)
    def _():
        o_ref[...] = acc_ref[...].astype(o_ref.dtype)


def _batched_inner_product(a, b, tm=None, tn=None, tk=None):
    B, M, D = a.shape
    _, N, _ = b.shape
    out_dtype = jnp.result_type(a.dtype, b.dtype)

    # MXU / lane friendly tiles: M on sublanes (mult. of 8), N and D on lanes
    # (mult. of 128).  Capped at 256 / 256 / 512 so double-buffered inputs +
    # resident accumulator stay well under v7x's smaller VMEM.
    tm = tm or min(256, _round_up(M, 8))
    tn = tn or min(256, _round_up(N, 128))
    tk = tk or min(512, _round_up(D, 128))

    Mp, Np, Dp = _round_up(M, tm), _round_up(N, tn), _round_up(D, tk)
    a_p = _pad_axis(_pad_axis(a, 1, Mp), 2, Dp)   # zero-padded D contributes 0
    b_p = _pad_axis(_pad_axis(b, 1, Np), 2, Dp)

    grid = (B, Mp // tm, Np // tn, Dp // tk)

    out_itemsize = jnp.dtype(out_dtype).itemsize
    cost = pl.CostEstimate(
        flops=2 * B * Mp * Np * Dp,
        bytes_accessed=(a_p.size * a_p.dtype.itemsize
                        + b_p.size * b_p.dtype.itemsize
                        + B * Mp * Np * out_itemsize),
        transcendentals=0,
    )

    out = pl.pallas_call(
        _bmm_nt_kernel,
        out_shape=jax.ShapeDtypeStruct((B, Mp, Np), out_dtype),
        grid_spec=pltpu.PrefetchScalarGridSpec(
            num_scalar_prefetch=0,
            grid=grid,
            in_specs=[
                pl.BlockSpec((None, tm, tk), lambda bi, i, j, k: (bi, i, k)),
                pl.BlockSpec((None, tn, tk), lambda bi, i, j, k: (bi, j, k)),
            ],
            out_specs=pl.BlockSpec((None, tm, tn),
                                   lambda bi, i, j, k: (bi, i, j)),
            scratch_shapes=[pltpu.VMEM((tm, tn), jnp.float32)],
        ),
        compiler_params=pltpu.CompilerParams(
            dimension_semantics=("parallel", "parallel", "parallel",
                                 "arbitrary"),
            vmem_limit_bytes=48 * 1024 * 1024,
        ),
        cost_estimate=cost,
    )(a_p, b_p)

    return out[:, :M, :N]


# --------------------------------------------------------------------------
# Fast path for 2-D inputs (both unsqueezed to M == N == 1): per-row dot.
# --------------------------------------------------------------------------
def _rowdot_kernel(a_ref, b_ref, o_ref):
    # a_ref, b_ref: (tb, Dp); o_ref: (tb, 128) (lane-dense broadcast store)
    prod = a_ref[...].astype(jnp.float32) * b_ref[...].astype(jnp.float32)
    s = jnp.sum(prod, axis=-1, keepdims=True)
    o_ref[...] = jnp.broadcast_to(s, o_ref.shape).astype(o_ref.dtype)


def _rowwise_inner_product(a, b, tb=None):
    B, D = a.shape
    out_dtype = jnp.result_type(a.dtype, b.dtype)

    tb = tb or min(512, _round_up(B, 8))
    Bp = _round_up(B, tb)
    Dp = _round_up(D, 128)

    a_p = _pad_axis(_pad_axis(a, 0, Bp), 1, Dp)
    b_p = _pad_axis(_pad_axis(b, 0, Bp), 1, Dp)

    cost = pl.CostEstimate(
        flops=2 * Bp * Dp,
        bytes_accessed=(a_p.size * a_p.dtype.itemsize
                        + b_p.size * b_p.dtype.itemsize
                        + Bp * 128 * jnp.dtype(out_dtype).itemsize),
        transcendentals=0,
    )

    out = pl.pallas_call(
        _rowdot_kernel,
        out_shape=jax.ShapeDtypeStruct((Bp, 128), out_dtype),
        grid_spec=pltpu.PrefetchScalarGridSpec(
            num_scalar_prefetch=0,
            grid=(Bp // tb,),
            in_specs=[
                pl.BlockSpec((tb, Dp), lambda i: (i, 0)),
                pl.BlockSpec((tb, Dp), lambda i: (i, 0)),
            ],
            out_specs=pl.BlockSpec((tb, 128), lambda i: (i, 0)),
        ),
        compiler_params=pltpu.CompilerParams(
            dimension_semantics=("parallel",),
            vmem_limit_bytes=48 * 1024 * 1024,
        ),
        cost_estimate=cost,
    )(a_p, b_p)

    return out[:B, :1].reshape(B, 1, 1)


# --------------------------------------------------------------------------
# Public wrapper (matches torch InnerProductSimilarity.forward semantics)
# --------------------------------------------------------------------------
def inner_product_similarity(a, b, *, tm=None, tn=None, tk=None):
    a2d = a.ndim == 2
    b2d = b.ndim == 2
    if a2d and b2d:
        # both (B, D) -> (B, 1, 1): vectorized row-dot instead of 1x1 matmuls
        return _rowwise_inner_product(a, b)
    if a2d:
        a = a[:, None, :]
    if b2d:
        b = b[:, None, :]
    assert a.ndim == 3 and b.ndim == 3
    assert a.shape[0] == b.shape[0] and a.shape[2] == b.shape[2], \
        "batch / feature dims must match"
    return _batched_inner_product(a, b, tm=tm, tn=tn, tk=tk)


if __name__ == "__main__":
    key = jax.random.PRNGKey(0)
    ka, kb, kc, kd = jax.random.split(key, 4)

    # --- small 3-D case -----------------------------------------------------
    B, M, N, D = 2, 8, 8, 32
    a = jax.random.normal(ka, (B, M, D), dtype=jnp.float32)
    b = jax.random.normal(kb, (B, N, D), dtype=jnp.float32)
    out = jax.block_until_ready(inner_product_similarity(a, b))
    ref = jnp.einsum("bmd,bnd->bmn", a, b)
    assert out.shape == (B, M, N)
    assert jnp.allclose(out, ref, atol=1e-4, rtol=1e-4)

    # --- multi-tile case exercising the accumulator / reduction grid axis ---
    B2, M2, N2, D2 = 2, 24, 200, 300
    a3 = jax.random.normal(kc, (B2, M2, D2), dtype=jnp.float32)
    b3 = jax.random.normal(kd, (B2, N2, D2), dtype=jnp.float32)
    out3 = jax.block_until_ready(
        inner_product_similarity(a3, b3, tm=8, tn=128, tk=128))
    ref3 = jnp.einsum("bmd,bnd->bmn", a3, b3)
    assert out3.shape == (B2, M2, N2)
    assert jnp.allclose(out3, ref3, atol=2e-3, rtol=2e-3)

    # --- 2-D input path (unsqueeze semantics -> (B, 1, 1)) ------------------
    a2 = jax.random.normal(ka, (B, D), dtype=jnp.float32)
    b2 = jax.random.normal(kb, (B, D), dtype=jnp.float32)
    out2 = jax.block_until_ready(inner_product_similarity(a2, b2))
    ref2 = jnp.einsum("bd,bd->b", a2, b2)[:, None, None]
    assert out2.shape == (B, 1, 1)
    assert jnp.allclose(out2, ref2, atol=1e-4, rtol=1e-4)

    print("KERNEL_OK")
</pallas_src>

<mosaic_0001>
module attributes {stable_mosaic.version = 11 : i64} {
  func.func @_bmm_nt_kernel(%arg0: i32, %arg1: i32, %arg2: i32, %arg3: i32, %arg4: memref<1x8x128xf32, #tpu.memory_space<vmem>>, %arg5: memref<1x128x128xf32, #tpu.memory_space<vmem>>, %arg6: memref<1x8x128xf32, #tpu.memory_space<vmem>>, %arg7: memref<8x128xf32, #tpu.memory_space<vmem>>) attributes {dimension_semantics = [#tpu.dimension_semantics<parallel>, #tpu.dimension_semantics<parallel>, #tpu.dimension_semantics<parallel>, #tpu.dimension_semantics<arbitrary>], iteration_bounds = array<i64: 2, 1, 1, 1>, scalar_prefetch = 0 : i64, scratch_operands = 1 : i64, tpu.core_type = #tpu.core_type<tc>, window_params = [{transform_indices = @transform_0, window_bounds = array<i64: 1, 8, 128>}, {transform_indices = @transform_1, window_bounds = array<i64: 1, 128, 128>}, {transform_indices = @transform_2, window_bounds = array<i64: 1, 8, 128>}]} {
    %c0_i32 = arith.constant 0 : i32
    %0 = arith.cmpi eq, %arg3, %c0_i32 : i32
    %1 = arith.extui %0 : i1 to i32
    %c0_i32_0 = arith.constant 0 : i32
    %2 = arith.cmpi ne, %1, %c0_i32_0 : i32
    scf.if %2 {
      %cst_12 = arith.constant 0.000000e+00 : f32
      %14 = vector.broadcast %cst_12 : f32 to vector<8x128xf32>
      %c0_13 = arith.constant 0 : index
      %c0_14 = arith.constant 0 : index
      %15 = vector.load %arg7[%c0_13, %c0_14] : memref<8x128xf32, #tpu.memory_space<vmem>>, vector<8x128xf32>
      tpu.vector_store %arg7[%c0_13, %c0_14], %14 {strides = array<i32>} : memref<8x128xf32, #tpu.memory_space<vmem>>, vector<8x128xf32>,
    } else {
    }
    %c0 = arith.constant 0 : index
    %c0_1 = arith.constant 0 : index
    %3 = vector.load %arg7[%c0, %c0_1] : memref<8x128xf32, #tpu.memory_space<vmem>>, vector<8x128xf32>
    %c0_2 = arith.constant 0 : index
    %c0_3 = arith.constant 0 : index
    %c0_4 = arith.constant 0 : index
    %4 = vector.load %arg4[%c0_2, %c0_3, %c0_4] : memref<1x8x128xf32, #tpu.memory_space<vmem>>, vector<1x8x128xf32>
    %5 = vector.shape_cast %4 : vector<1x8x128xf32> to vector<8x128xf32>
    %c0_5 = arith.constant 0 : index
    %c0_6 = arith.constant 0 : index
    %c0_7 = arith.constant 0 : index
    %6 = vector.load %arg5[%c0_5, %c0_6, %c0_7] : memref<1x128x128xf32, #tpu.memory_space<vmem>>, vector<1x128x128xf32>
    %7 = vector.shape_cast %6 : vector<1x128x128xf32> to vector<128x128xf32>
    %cst = arith.constant dense<0.000000e+00> : vector<8x128xf32>
    %8 = tpu.matmul %5, %7, %cst {dimension_numbers = #tpu.dot_dimension_numbers<[1], [1], [0], [0], [0, 0, 1, 0], [], []>} : vector<8x128xf32>, vector<128x128xf32>, vector<8x128xf32> -> vector<8x128xf32>
    %9 = arith.addf %3, %8 : vector<8x128xf32>
    %c0_8 = arith.constant 0 : index
    %c0_9 = arith.constant 0 : index
    %10 = vector.load %arg7[%c0_8, %c0_9] : memref<8x128xf32, #tpu.memory_space<vmem>>, vector<8x128xf32>
    tpu.vector_store %arg7[%c0_8, %c0_9], %9 {strides = array<i32>} : memref<8x128xf32, #tpu.memory_space<vmem>>, vector<8x128xf32>,
    %c0_i32_10 = arith.constant 0 : i32
    %11 = arith.cmpi eq, %arg3, %c0_i32_10 : i32
    %12 = arith.extui %11 : i1 to i32
    %c0_i32_11 = arith.constant 0 : i32
    %13 = arith.cmpi ne, %12, %c0_i32_11 : i32
    scf.if %13 {
      %c0_12 = arith.constant 0 : index
      %c0_13 = arith.constant 0 : index
      %14 = vector.load %arg7[%c0_12, %c0_13] : memref<8x128xf32, #tpu.memory_space<vmem>>, vector<8x128xf32>
      %c0_14 = arith.constant 0 : index
      %c0_15 = arith.constant 0 : index
      %c0_16 = arith.constant 0 : index
      %15 = vector.load %arg6[%c0_14, %c0_15, %c0_16] : memref<1x8x128xf32, #tpu.memory_space<vmem>>, vector<1x8x128xf32>
      %16 = vector.shape_cast %15 : vector<1x8x128xf32> to vector<8x128xf32>
      %17 = vector.shape_cast %14 : vector<8x128xf32> to vector<1x8x128xf32>
      tpu.vector_store %arg6[%c0_14, %c0_15, %c0_16], %17 {strides = array<i32>} : memref<1x8x128xf32, #tpu.memory_space<vmem>>, vector<1x8x128xf32>,
    } else {
    }
    return
  }
  func.func @transform_0(%arg0: i32, %arg1: i32, %arg2: i32, %arg3: i32) -> (i32, i32, i32) {
    %c0_i32 = arith.constant 0 : i32
    return %arg0, %arg1, %arg3 : i32, i32, i32
  }
  func.func @transform_1(%arg0: i32, %arg1: i32, %arg2: i32, %arg3: i32) -> (i32, i32, i32) {
    %c0_i32 = arith.constant 0 : i32
    return %arg0, %arg2, %arg3 : i32, i32, i32
  }
  func.func @transform_2(%arg0: i32, %arg1: i32, %arg2: i32, %arg3: i32) -> (i32, i32, i32) {
    %c0_i32 = arith.constant 0 : i32
    return %arg0, %arg1, %arg2 : i32, i32, i32
  }
}

</mosaic_0001>

<bundles_post_ra>
// kernel: tpu_custom_call.1
= control target key start
LH: loop header
LB: loop body
LE: loop exit
PB: predicated region body
PF: predicated region fallthrough
CT: control target
= control target key end

     0   :  { %7 = vsyncpa [#allocation4], 0  ;;  %s851_s0 = inlined_call_operand.hbm [shape: f32[2,8,128], index: 0, kind: input, shape index: {}]   ;;  %s852_s1 = inlined_call_operand.hbm [shape: f32[2,128,128], index: 1, kind: input, shape index: {}]   ;;  %s853_s2 = inlined_call_operand.hbm [shape: f32[2,8,128], index: 2, kind: output, shape index: {}]  }
   0x1   :  { %9 = vsyncpa [#allocation4 + $0x1], 0 }
   0x2   :  { %10 = vsyncpa [#allocation7], 0 }
   0x3   :  { %12 = vsyncpa [#allocation7 + $0x1], 0 }
   0x4   :  { %13 = vsyncpa [#allocation5], 0 }
   0x5   :  { %15 = vsyncpa [#allocation5 + $0x1], 0  ;;  %s682_s9 = smov 0   ;;  %s684_s10 = smov 0  }
   0x6   :  { %s686_s11 = smov 0   ;;  %s688_s12 = smov 0  }
   0x7   :  { %s690_s13 = smov 0   ;;  %s692_s14 = smov 0  }
   0x8 LB: > { %s430_s15 = sadd.s32 4294967295, %s663_s14   ;;  %s431_s16 = sadd.s32 4294967294, %s663_s14   ;;  %s663_s14 = sphi %s692_s14, %s21_s14   ;;  %s659_s13 = sphi %s690_s13, %s863_s13   ;;  %s655_s12 = sphi %s688_s12, %s862_s12   ;;  %s651_s11 = sphi %s686_s11, %s861_s11   ;;  %s647_s10 = sphi %s684_s10, %s860_s10   ;;  %s643_s9 = sphi %s682_s9, %s859_s9  }
   0x9   : > { %s47_s17 = sadd.s32 1, %s659_s13  ;;  %s58_s18 = sadd.s32 1, %s651_s11 }
   0xa   : > { %p49_p0 = scmp.ge.s32.totalorder %s47_s17, 2  ;;  %p65_p1 = scmp.ne.s32.totalorder %s651_s11, %s647_s10 }
   0xb   : > { %p66_p2 = scmp.eq.s32.totalorder %s663_s14, 0  ;;  %p71_p3 = scmp.ne.s32.totalorder %s647_s10, %s643_s9 }
   0xc   : > { %s865_s17 = smov (%p49_p0, %s47_s17), 0  ;;  %p72_p5 = scmp.eq.s32.totalorder %s430_s15, 0 }
   0xd   : > { %p723_p4 = por %p66_p2, %p65_p1  ;;  %s51_s20 = ssub.s32 %s659_s13, %s865_s17 }
   0xe   : > { %p129_p6 = scmp.eq.s32.totalorder %s430_s15, 1  ;;  %p56_p7 = scmp.eq.s32.totalorder %s51_s20, 0 }
   0xf   : > { %p729_p8 = por %p72_p5, %p71_p3  ;;  %p135_p10 = scmp.eq.s32.totalorder %s431_s16, 1 }
  0x10   : > { %p733_p9 = por %p129_p6, %p65_p1  ;;  %p433_p12 = scmp.ge.s32.totalorder %s663_s14, 2 }
  0x11   : > { %s738_s23 = scalar_select %p56_p7, %s651_s11, %s58_s18  }
  0x12   : > { %p740_p11 = por %p135_p10, %p71_p3  ;;  %p465_p13 = scmp.lt.s32.totalorder %s663_s14, 2 }
  0x13   : > { %s747_s25 = sand.u32 1, %s651_s11   ;;  %s435_s27 = sshll.u32 %s659_s13, 3 }
  0x14   : > { %s434_s26 = sshll.u32 %s747_s25, 3  ;;  %s165_s30 = scalar_lea.hbm %s851_s0, %s435_s27 }
  0x15   : > { %s159_s3 = scalar_lea.vmem [#allocation3], %s434_s26  ;;  %s167_s5 = sshll.u32 %s165_s30, 4  ;;  %s168_s5 = int_to_ptr.hbm [resolvable:$true] %s167_s5 }
  0x16   : > { %s169_s4 = sshll.u32 %s159_s3, 4  ;;  %p756_p0 = pnand %p465_p13, %p723_p4  ;;  %s170_s4 = int_to_ptr.vmem [resolvable:$true] %s169_s4 }
  0x17   : > { %p439_p1 = scmp.ge.s32.totalorder %s663_s14, 1  ;;  %p199_p2 = scmp.lt.s32.totalorder %s663_s14, 3 }
  0x18   : > { %s156_s7 = scalar_lea.sflag [#allocation4], %s747_s25  ;;  %s436_s8 = sshll.u32 %s747_s25, 7 }
  0x19   : > { %457 = dma.hbm_to_vmem [thread:$0]  (!%p756_p0), %s168_s5, 128, %s170_s4, %s156_s7  }
  0x1a   : > { %p200_p3 = pnand %p439_p1, %p199_p2  ;;  %s447_s15 = sshll.u32 %s659_s13, 7 }
  0x1b   : > { %s188_s20 = scalar_lea.hbm %s852_s1, %s447_s15  ;;  %s180_s26 = scalar_lea.vmem [#allocation6], %s436_s8 }
  0x1c   : > { %s191_s19 = sshll.u32 %s180_s26, 4  ;;  %s189_s27 = sshll.u32 %s188_s20, 4  ;;  %s192_s19 = int_to_ptr.vmem [resolvable:$true] %s191_s19  ;;  %s190_s27 = int_to_ptr.hbm [resolvable:$true] %s189_s27 }
  0x1d   : > { %s177_s28 = scalar_lea.sflag [#allocation7], %s747_s25  ;;  %s665_s29 = smov 128  }
  0x1e   : > { %s666_s30 = smov 8   ;;  %203 = sbr.rel (%p200_p3) target bundleno = 232 (0xe8), region = 28 }
  0x1f   : > { %460 = dma.hbm_to_vmem [thread:$0]  (!%p756_p0), %s190_s27, 2048, %s192_s19, %s177_s28, %s665_s29, %s665_s29, %s666_s30  }
  0x20   : > { %s774_s3 = sand.u32 (!%p200_p3), 1, %s647_s10  }
  0x21   : > { %s440_s4 = sshll.u32 (!%p200_p3), %s774_s3, 3  ;;  %s206_s5 = scalar_lea.sflag (!%p200_p3), [#allocation4], %s774_s3 }
  0x22   : > { %s780_s7 = scalar_lea.vmem (!%p200_p3), [#allocation3], %s440_s4 }
  0x23   : > { %630 = dma.done.wait (%p729_p8), %s206_s5, 128  }
  0x24   : > { %632 = vsyncadd (%p729_p8), %s206_s5, 4294967168  ;;  %s441_s25 = sshll.u32 %s774_s3, 7  ;;  %s216_s6 = scalar_lea.sflag [#allocation7], %s774_s3 }
  0x25   : > { %s788_s8 = scalar_lea.vmem [#allocation6], %s441_s25 }
  0x26   : > { %634 = dma.done.wait (%p729_p8), %s216_s6, 2048  }
  0x27   : > { %636 = vsyncadd (%p729_p8), %s216_s6, 4294965248  ;;  %v269_v0 = vld [vmem:[%s788_s8 + $0x78] sm:$0xff]  ;;  %v268_v1 = vld [vmem:[%s788_s8 + $0x70] sm:$0xff]  ;;  %s444_s21 = sshll.u32 %s655_s12, 3  ;;  %s245_s20 = scalar_lea.vmem [#allocation8], %s440_s4 }
  0x28   : > { %270 = vmatpush.xpose.msra.mxu0 %v269_v0  ;;  %v267_v2 = vld [vmem:[%s788_s8 + $0x68] sm:$0xff]  ;;  %v266_v3 = vld [vmem:[%s788_s8 + $0x60] sm:$0xff]  ;;  %v265_v4 = vld [vmem:[%s788_s8 + $0x58] sm:$0xff]  ;;  %s310_s18 = scalar_lea.hbm %s853_s2, %s444_s21  ;;  %s312_s26 = sshll.u32 %s245_s20, 4  ;;  %s313_s26 = int_to_ptr.vmem [resolvable:$true] %s312_s26 }
  0x29   : > { %v264_v5 = vld [vmem:[%s788_s8 + $0x50] sm:$0xff]  ;;  %v263_v6 = vld [vmem:[%s788_s8 + $0x48] sm:$0xff]  ;;  %v262_v7 = vld [vmem:[%s788_s8 + $0x40] sm:$0xff]  ;;  %s314_s19 = sshll.u32 %s310_s18, 4  ;;  %s298_s27 = scalar_lea.sflag [#allocation5], %s774_s3  ;;  %s315_s19 = int_to_ptr.hbm [resolvable:$true] %s314_s19 }
  0x2a   : > { %v261_v8 = vld [vmem:[%s788_s8 + $0x38] sm:$0xff]  ;;  %v260_v9 = vld [vmem:[%s788_s8 + $0x30] sm:$0xff]  ;;  %v259_v10 = vld [vmem:[%s788_s8 + $0x28] sm:$0xff]  ;;  %s591_s28 = sshra.s32 %s315_s19, 4  ;;  %s597_s5 = scalar_lea.hbm %s853_s2, 16  ;;  %s592_s28 = int_to_ptr.hbm [resolvable:$true] %s591_s28 }
  0x2b   : > { %v258_v11 = vld [vmem:[%s788_s8 + $0x20] sm:$0xff]  ;;  %v257_v12 = vld [vmem:[%s788_s8 + $0x18] sm:$0xff]  ;;  %v256_v13 = vld [vmem:[%s788_s8 + $0x10] sm:$0xff]  ;;  %s593_s29 = scalar_lea.hbm %s592_s28, 8  ;;  %p598_p7 = scmp.lt.s32.totalorder %s592_s28, %s853_s2 }
  0x2c   : > { %271 = vmatpush.xpose.msra.mxu0 %v268_v1  ;;  %v255_v14 = vld [vmem:[%s788_s8 + $0x8] sm:$0xff]  ;;  %v254_v15 = vld [vmem:[%s788_s8] sm:$0xff]  ;;  %v253_v16 = vld [vmem:[%s780_s7] sm:$0xff]  ;;  %p594_p4 = scmp.ne.s32.totalorder %s592_s28, %s593_s29  ;;  %p599_p8 = scmp.lt.s32.totalorder %s597_s5, %s593_s29 }
  0x2e   : > { %p595_p5 = pnand %p594_p4, %p733_p9  ;;  %p600_p10 = por %p599_p8, %p598_p7 }
  0x30   : > { %272 = vmatpush.xpose.msra.mxu0 %v267_v2  ;;  %p596_p6 = pneg %p595_p5 }
  0x32   : > { %p601_p13 = pnand %p600_p10, %p596_p6 }
  0x34   : > { %273 = vmatpush.xpose.msra.mxu0 %v266_v3 }
  0x38   : > { %274 = vmatpush.xpose.msra.mxu0 %v265_v4 }
  0x3c   : > { %275 = vmatpush.xpose.msra.mxu0 %v264_v5 }
  0x40   : > { %276 = vmatpush.xpose.msra.mxu0 %v263_v6 }
  0x44   : > { %277 = vmatpush.xpose.msra.mxu0 %v262_v7 }
  0x48   : > { %278 = vmatpush.xpose.msra.mxu0 %v261_v8 }
  0x4c   : > { %279 = vmatpush.xpose.msra.mxu0 %v260_v9 }
  0x50   : > { %280 = vmatpush.xpose.msra.mxu0 %v259_v10 }
  0x54   : > { %281 = vmatpush.xpose.msra.mxu0 %v258_v11 }
  0x58   : > { %282 = vmatpush.xpose.msra.mxu0 %v257_v12 }
  0x5c   : > { %283 = vmatpush.xpose.msra.mxu0 %v256_v13 }
  0x60   : > { %284 = vmatpush.xpose.msra.mxu0 %v255_v14 }
  0x64   : > { %285 = vmatpush.xpose.msra.mxu0 %v254_v15 }
  0x67   : > { %286 = vmatmul.f32.vlgmr.msra.gmra.mxu0 %v253_v16 }
  0xe4   : > { %v287_v17 = vpop.f32.mrf.mxu0 }
  0xe5   : > { %296 = vst [vmem:[%s245_s20] sm:$0xff] %v287_v17 }
  0xe6   : > { %604 = shalt.err (!%p601_p13)
}
  0xe7   : > { %452 = dma.vmem_to_hbm [thread:$0]  (%p733_p9), %s313_s26, 128, %s315_s19, %s298_s27  }
  0xe8 PF: > { %s326_s3 = sand.u32 1, %s643_s9   ;;  %p462_p0 = pnand %p433_p12, %p740_p11 }
  0xe9   : > { %s327_s25 = scalar_lea.sflag [#allocation5], %s326_s3 }
  0xea   : > { %p463_p1 = pneg %p462_p0 }
  0xec   : > { %638 = dma.done.wait (%p463_p1), %s327_s25, 128  }
  0xed   : > { %640 = vsyncadd (%p463_p1), %s327_s25, 4294967168  ;;  %s21_s14 = sadd.s32 1, %s663_s14   ;;  %s859_s9 = smov %s647_s10 }
  0xee   : > { %p18_p2 = scmp.ge.s32.totalorder %s21_s14, 4   ;;  %s860_s10 = smov %s651_s11 }
  0xef   : > { %s861_s11 = smov %s738_s23  ;;  %s862_s12 = smov %s659_s13 }
  0xf0   : > { %s863_s13 = smov %s865_s17  ;;  %20 = sbr.rel (!%p18_p2) target bundleno = 8 (0x8), region = 94 }
  0xf5   :  { %333 = vsyncpa [#allocation4], 1 }
  0xf6   :  { %335 = vsyncpa [#allocation4 + $0x1], 1 }
  0xf7   :  { %336 = vsyncpa [#allocation7], 1 }
  0xf8   :  { %338 = vsyncpa [#allocation7 + $0x1], 1 }
  0xf9   :  { %339 = vsyncpa [#allocation5], 1 }
  0xfa   :  { %341 = vsyncpa [#allocation5 + $0x1], 1 }

</bundles_post_ra>
